<compile_context>
chip_gen: v7x
topology: tpu7x:2x2x1
jax: 0.10.0
libtpu: 0.0.40
codegen_flags: <defaults>
</compile_context>

<pallas_src>
import functools

import jax
import jax.numpy as jnp
from jax import lax
from jax.experimental import pallas as pl
from jax.experimental.pallas import tpu as pltpu


def _round_up(x, m):
    return ((x + m - 1) // m) * m


def _choose_batch_tile(bp):
    # bp is a multiple of 8; pick the largest tile in {64, 32, 16, 8} dividing it.
    for tb in (64, 32, 16, 8):
        if bp % tb == 0:
            return tb
    return bp


def _simclr_kernel(x_ref, wc_ref, bc_ref, w1_ref, b1_ref, w2_ref, b2_ref,
                   out_ref, feat_ref, *, tb, hw):
    """One batch tile per grid step.

    x_ref:    (TB, C, HW)   images, NCHW with spatial flattened
    wc_ref:   (F, C)        1x1 conv weight (transposed layout)
    bc_ref:   (F, 1)        conv bias (column)
    w1_ref:   (F, F), b1_ref: (1, F)
    w2_ref:   (F, D), b2_ref: (1, D)
    out_ref:  (TB, D)       projections
    feat_ref: (TB, F)       backbone features
    """
    wct = wc_ref[...]                      # (F, C)
    bc = bc_ref[...]                       # (F, 1)
    f_dim = wct.shape[0]

    # Constants hoisted out of the per-sample loop.
    inv_hw = jnp.full((1, hw), 1.0 / hw, dtype=jnp.float32)          # pooling row
    sub_ids = lax.broadcasted_iota(jnp.int32, (tb, 1), 0)            # (TB, 1)

    # --- backbone: 1x1 conv -> ReLU -> global average pool ---
    # Lane-dense per-sample compute: h_b is (F, HW) with HW on the lane axis.
    feat = jnp.zeros((tb, f_dim), jnp.float32)
    for b in range(tb):                    # small static unroll over the tile
        xb = x_ref[b]                                                # (C, HW)
        hb = jnp.dot(wct, xb, preferred_element_type=jnp.float32) + bc
        hb = jnp.maximum(hb, 0.0)                                    # (F, HW)
        # Global average pool over HW expressed as a dot contracting the lane
        # axis of both operands -> directly yields a (1, F) row (no transpose).
        fb = lax.dot_general(inv_hw, hb, (((1,), (1,)), ((), ())),
                             preferred_element_type=jnp.float32)     # (1, F)
        # Place row b of the feature tile via a masked broadcast.
        feat = feat + fb * (sub_ids == b).astype(jnp.float32)

    feat_ref[...] = feat.astype(feat_ref.dtype)

    # --- projection head on the whole (TB, F) tile: Linear -> ReLU -> Linear ---
    z = jnp.dot(feat, w1_ref[...], preferred_element_type=jnp.float32) + b1_ref[...]
    z = jnp.maximum(z, 0.0)
    z = jnp.dot(z, w2_ref[...], preferred_element_type=jnp.float32) + b2_ref[...]
    out_ref[...] = z.astype(out_ref.dtype)


@jax.jit
def _simclr_pallas(params, x_nchw):
    """Backbone + projection head for a (possibly fused) batch of NCHW images."""
    B, C, H, W = x_nchw.shape
    F = params["w1"].shape[0]
    D = params["w2"].shape[1]
    HW = H * W

    # Pad batch to a multiple of 8 so every block is (8,128)-friendly.
    Bp = max(_round_up(B, 8), 8)
    TB = _choose_batch_tile(Bp)

    xr = x_nchw.astype(jnp.float32).reshape(B, C, HW)   # NCHW -> (B, C, HW), no transpose
    if Bp != B:
        xr = jnp.pad(xr, ((0, Bp - B), (0, 0), (0, 0)))

    grid = (Bp // TB,)
    w_map = lambda i: (0, 0)   # constant index_map: weight blocks stay resident

    kernel = functools.partial(_simclr_kernel, tb=TB, hw=HW)

    out, feat = pl.pallas_call(
        kernel,
        out_shape=(
            jax.ShapeDtypeStruct((Bp, D), jnp.float32),  # projections
            jax.ShapeDtypeStruct((Bp, F), jnp.float32),  # backbone features
        ),
        grid=grid,
        in_specs=[
            pl.BlockSpec((TB, C, HW), lambda i: (i, 0, 0)),  # x
            pl.BlockSpec((F, C), w_map),                      # conv weight (F, C)
            pl.BlockSpec((F, 1), w_map),                      # conv bias   (F, 1)
            pl.BlockSpec((F, F), w_map),                      # proj w1
            pl.BlockSpec((1, F), w_map),                      # proj b1
            pl.BlockSpec((F, D), w_map),                      # proj w2
            pl.BlockSpec((1, D), w_map),                      # proj b2
        ],
        out_specs=(
            pl.BlockSpec((TB, D), lambda i: (i, 0)),
            pl.BlockSpec((TB, F), lambda i: (i, 0)),
        ),
        compiler_params=pltpu.CompilerParams(
            dimension_semantics=("parallel",)),
    )(xr, params["w_conv"], params["b_conv"], params["w1"], params["b1"],
      params["w2"], params["b2"])

    return out[:B], feat[:B]


def simclr_forward(params, x0, x1=None, return_features=False):
    """Mirrors SimCLR.forward semantics (single / dual input, return_features)."""
    if x1 is None:
        out0, f0 = _simclr_pallas(params, x0)
        return (out0, f0) if return_features else out0

    # Fuse both views into a single pallas_call (shared weight DMAs / launch).
    B0 = x0.shape[0]
    x = jnp.concatenate([x0, x1], axis=0)
    out, feat = _simclr_pallas(params, x)
    out0, out1 = out[:B0], out[B0:]
    f0, f1 = feat[:B0], feat[B0:]
    res0 = (out0, f0) if return_features else out0
    res1 = (out1, f1) if return_features else out1
    return res0, res1


def init_params(key, in_channels=4, num_ftrs=32, out_dim=128):
    k = jax.random.split(key, 3)
    return {
        "w_conv": 0.1 * jax.random.normal(k[0], (num_ftrs, in_channels), jnp.float32),
        "b_conv": jnp.zeros((num_ftrs, 1), jnp.float32),
        "w1": 0.1 * jax.random.normal(k[1], (num_ftrs, num_ftrs), jnp.float32),
        "b1": jnp.zeros((1, num_ftrs), jnp.float32),
        "w2": 0.1 * jax.random.normal(k[2], (num_ftrs, out_dim), jnp.float32),
        "b2": jnp.zeros((1, out_dim), jnp.float32),
    }


def _reference_forward(params, x_nchw):
    """Pure-JAX reference of the same forward (for a sanity check)."""
    B, C, H, W = x_nchw.shape
    x = x_nchw.astype(jnp.float32).reshape(B, C, H * W)
    h = jnp.einsum("fc,bcs->bfs", params["w_conv"], x) + params["b_conv"][None, :, :]
    h = jnp.maximum(h, 0.0)
    f = jnp.mean(h, axis=-1)                                   # (B, F)
    z = jnp.maximum(f @ params["w1"] + params["b1"], 0.0)
    z = z @ params["w2"] + params["b2"]
    return z, f


if __name__ == "__main__":
    key = jax.random.PRNGKey(0)
    kp, k0, k1 = jax.random.split(key, 3)

    B, C, H, W = 2, 4, 16, 16
    NUM_FTRS, OUT_DIM = 32, 128

    params = init_params(kp, in_channels=C, num_ftrs=NUM_FTRS, out_dim=OUT_DIM)
    x0 = jax.random.normal(k0, (B, C, H, W), jnp.float32)
    x1 = jax.random.normal(k1, (B, C, H, W), jnp.float32)

    # two inputs, two outputs, with intermediate features (single fused kernel call)
    (out0, f0), (out1, f1) = simclr_forward(params, x0, x1, return_features=True)
    jax.block_until_ready((out0, f0, out1, f1))

    assert out0.shape == (B, OUT_DIM) and out1.shape == (B, OUT_DIM)
    assert f0.shape == (B, NUM_FTRS) and f1.shape == (B, NUM_FTRS)

    # sanity check against a pure-JAX reference (loose tol: MXU accumulation order)
    ro0, rf0 = _reference_forward(params, x0)
    ro1, rf1 = _reference_forward(params, x1)
    for got, ref in ((out0, ro0), (f0, rf0), (out1, ro1), (f1, rf1)):
        err = float(jnp.max(jnp.abs(got - ref)))
        scale = float(jnp.max(jnp.abs(ref))) + 1e-6
        assert err / scale < 1e-2, f"mismatch: rel err {err / scale}"

    # single-input path as well
    out_single = simclr_forward(params, x0)
    jax.block_until_ready(out_single)
    assert out_single.shape == (B, OUT_DIM)

    print("KERNEL_OK")
</pallas_src>

<mosaic_0001>
module attributes {stable_mosaic.version = 11 : i64} {
  func.func @_simclr_kernel(%arg0: i32, %arg1: memref<8x4x256xf32, #tpu.memory_space<vmem>>, %arg2: memref<32x4xf32, #tpu.memory_space<vmem>>, %arg3: memref<32x1xf32, #tpu.memory_space<vmem>>, %arg4: memref<32x32xf32, #tpu.memory_space<vmem>>, %arg5: memref<1x32xf32, #tpu.memory_space<vmem>>, %arg6: memref<32x128xf32, #tpu.memory_space<vmem>>, %arg7: memref<1x128xf32, #tpu.memory_space<vmem>>, %arg8: memref<8x128xf32, #tpu.memory_space<vmem>>, %arg9: memref<8x32xf32, #tpu.memory_space<vmem>>) attributes {dimension_semantics = [#tpu.dimension_semantics<parallel>], iteration_bounds = array<i64: 1>, scalar_prefetch = 0 : i64, scratch_operands = 0 : i64, tpu.core_type = #tpu.core_type<tc>, window_params = [{transform_indices = @transform_0, window_bounds = array<i64: 8, 4, 256>}, {pipeline_mode = #tpu.pipeline_mode<synchronous>, transform_indices = @transform_1, window_bounds = array<i64: 32, 4>}, {pipeline_mode = #tpu.pipeline_mode<synchronous>, transform_indices = @transform_2, window_bounds = array<i64: 32, 1>}, {pipeline_mode = #tpu.pipeline_mode<synchronous>, transform_indices = @transform_3, window_bounds = array<i64: 32, 32>}, {pipeline_mode = #tpu.pipeline_mode<synchronous>, transform_indices = @transform_4, window_bounds = array<i64: 1, 32>}, {pipeline_mode = #tpu.pipeline_mode<synchronous>, transform_indices = @transform_5, window_bounds = array<i64: 32, 128>}, {pipeline_mode = #tpu.pipeline_mode<synchronous>, transform_indices = @transform_6, window_bounds = array<i64: 1, 128>}, {transform_indices = @transform_7, window_bounds = array<i64: 8, 128>}, {transform_indices = @transform_8, window_bounds = array<i64: 8, 32>}]} {
    %c0 = arith.constant 0 : index
    %c0_0 = arith.constant 0 : index
    %0 = vector.load %arg2[%c0, %c0_0] : memref<32x4xf32, #tpu.memory_space<vmem>>, vector<32x4xf32>
    %c0_1 = arith.constant 0 : index
    %c0_2 = arith.constant 0 : index
    %1 = vector.load %arg3[%c0_1, %c0_2] : memref<32x1xf32, #tpu.memory_space<vmem>>, vector<32x1xf32>
    %cst = arith.constant 3.906250e-03 : f32
    %2 = vector.broadcast %cst : f32 to vector<1x256xf32>
    %3 = tpu.iota {dimensions = array<i32: 0>} : vector<8x1xi32>
    %cst_3 = arith.constant 0.000000e+00 : f32
    %4 = vector.broadcast %cst_3 : f32 to vector<8x32xf32>
    %c0_4 = arith.constant 0 : index
    %c0_5 = arith.constant 0 : index
    %c0_6 = arith.constant 0 : index
    %5 = vector.load %arg1[%c0_4, %c0_5, %c0_6] : memref<8x4x256xf32, #tpu.memory_space<vmem>>, vector<1x4x256xf32>
    %6 = vector.shape_cast %5 : vector<1x4x256xf32> to vector<4x256xf32>
    %cst_7 = arith.constant dense<0.000000e+00> : vector<32x256xf32>
    %7 = tpu.matmul %0, %6, %cst_7 {dimension_numbers = #tpu.dot_dimension_numbers<[1], [0], [0], [1], [0, 0, 1, 1], [], []>} : vector<32x4xf32>, vector<4x256xf32>, vector<32x256xf32> -> vector<32x256xf32>
    %8 = vector.broadcast %1 : vector<32x1xf32> to vector<32x256xf32>
    %9 = arith.addf %7, %8 : vector<32x256xf32>
    %cst_8 = arith.constant 0.000000e+00 : f32
    %10 = vector.broadcast %cst_8 : f32 to vector<32x256xf32>
    %11 = arith.maximumf %9, %10 : vector<32x256xf32>
    %cst_9 = arith.constant dense<0.000000e+00> : vector<1x32xf32>
    %12 = tpu.matmul %2, %11, %cst_9 {dimension_numbers = #tpu.dot_dimension_numbers<[1], [1], [0], [0], [0, 0, 1, 0], [], []>} : vector<1x256xf32>, vector<32x256xf32>, vector<1x32xf32> -> vector<1x32xf32>
    %c0_i32 = arith.constant 0 : i32
    %13 = vector.broadcast %c0_i32 : i32 to vector<8x1xi32>
    %14 = arith.cmpi eq, %3, %13 : vector<8x1xi32>
    %15 = arith.extui %14 : vector<8x1xi1> to vector<8x1xi32>
    %16 = arith.sitofp %15 : vector<8x1xi32> to vector<8x1xf32>
    %17 = vector.broadcast %12 : vector<1x32xf32> to vector<8x32xf32>
    %18 = vector.broadcast %16 : vector<8x1xf32> to vector<8x32xf32>
    %19 = arith.mulf %17, %18 : vector<8x32xf32>
    %20 = arith.addf %4, %19 : vector<8x32xf32>
    %c1 = arith.constant 1 : index
    %c0_10 = arith.constant 0 : index
    %c0_11 = arith.constant 0 : index
    %21 = vector.load %arg1[%c1, %c0_10, %c0_11] : memref<8x4x256xf32, #tpu.memory_space<vmem>>, vector<1x4x256xf32>
    %22 = vector.shape_cast %21 : vector<1x4x256xf32> to vector<4x256xf32>
    %cst_12 = arith.constant dense<0.000000e+00> : vector<32x256xf32>
    %23 = tpu.matmul %0, %22, %cst_12 {dimension_numbers = #tpu.dot_dimension_numbers<[1], [0], [0], [1], [0, 0, 1, 1], [], []>} : vector<32x4xf32>, vector<4x256xf32>, vector<32x256xf32> -> vector<32x256xf32>
    %24 = vector.broadcast %1 : vector<32x1xf32> to vector<32x256xf32>
    %25 = arith.addf %23, %24 : vector<32x256xf32>
    %cst_13 = arith.constant 0.000000e+00 : f32
    %26 = vector.broadcast %cst_13 : f32 to vector<32x256xf32>
    %27 = arith.maximumf %25, %26 : vector<32x256xf32>
    %cst_14 = arith.constant dense<0.000000e+00> : vector<1x32xf32>
    %28 = tpu.matmul %2, %27, %cst_14 {dimension_numbers = #tpu.dot_dimension_numbers<[1], [1], [0], [0], [0, 0, 1, 0], [], []>} : vector<1x256xf32>, vector<32x256xf32>, vector<1x32xf32> -> vector<1x32xf32>
    %c1_i32 = arith.constant 1 : i32
    %29 = vector.broadcast %c1_i32 : i32 to vector<8x1xi32>
    %30 = arith.cmpi eq, %3, %29 : vector<8x1xi32>
    %31 = arith.extui %30 : vector<8x1xi1> to vector<8x1xi32>
    %32 = arith.sitofp %31 : vector<8x1xi32> to vector<8x1xf32>
    %33 = vector.broadcast %28 : vector<1x32xf32> to vector<8x32xf32>
    %34 = vector.broadcast %32 : vector<8x1xf32> to vector<8x32xf32>
    %35 = arith.mulf %33, %34 : vector<8x32xf32>
    %36 = arith.addf %20, %35 : vector<8x32xf32>
    %c2 = arith.constant 2 : index
    %c0_15 = arith.constant 0 : index
    %c0_16 = arith.constant 0 : index
    %37 = vector.load %arg1[%c2, %c0_15, %c0_16] : memref<8x4x256xf32, #tpu.memory_space<vmem>>, vector<1x4x256xf32>
    %38 = vector.shape_cast %37 : vector<1x4x256xf32> to vector<4x256xf32>
    %cst_17 = arith.constant dense<0.000000e+00> : vector<32x256xf32>
    %39 = tpu.matmul %0, %38, %cst_17 {dimension_numbers = #tpu.dot_dimension_numbers<[1], [0], [0], [1], [0, 0, 1, 1], [], []>} : vector<32x4xf32>, vector<4x256xf32>, vector<32x256xf32> -> vector<32x256xf32>
    %40 = vector.broadcast %1 : vector<32x1xf32> to vector<32x256xf32>
    %41 = arith.addf %39, %40 : vector<32x256xf32>
    %cst_18 = arith.constant 0.000000e+00 : f32
    %42 = vector.broadcast %cst_18 : f32 to vector<32x256xf32>
    %43 = arith.maximumf %41, %42 : vector<32x256xf32>
    %cst_19 = arith.constant dense<0.000000e+00> : vector<1x32xf32>
    %44 = tpu.matmul %2, %43, %cst_19 {dimension_numbers = #tpu.dot_dimension_numbers<[1], [1], [0], [0], [0, 0, 1, 0], [], []>} : vector<1x256xf32>, vector<32x256xf32>, vector<1x32xf32> -> vector<1x32xf32>
    %c2_i32 = arith.constant 2 : i32
    %45 = vector.broadcast %c2_i32 : i32 to vector<8x1xi32>
    %46 = arith.cmpi eq, %3, %45 : vector<8x1xi32>
    %47 = arith.extui %46 : vector<8x1xi1> to vector<8x1xi32>
    %48 = arith.sitofp %47 : vector<8x1xi32> to vector<8x1xf32>
    %49 = vector.broadcast %44 : vector<1x32xf32> to vector<8x32xf32>
    %50 = vector.broadcast %48 : vector<8x1xf32> to vector<8x32xf32>
    %51 = arith.mulf %49, %50 : vector<8x32xf32>
    %52 = arith.addf %36, %51 : vector<8x32xf32>
    %c3 = arith.constant 3 : index
    %c0_20 = arith.constant 0 : index
    %c0_21 = arith.constant 0 : index
    %53 = vector.load %arg1[%c3, %c0_20, %c0_21] : memref<8x4x256xf32, #tpu.memory_space<vmem>>, vector<1x4x256xf32>
    %54 = vector.shape_cast %53 : vector<1x4x256xf32> to vector<4x256xf32>
    %cst_22 = arith.constant dense<0.000000e+00> : vector<32x256xf32>
    %55 = tpu.matmul %0, %54, %cst_22 {dimension_numbers = #tpu.dot_dimension_numbers<[1], [0], [0], [1], [0, 0, 1, 1], [], []>} : vector<32x4xf32>, vector<4x256xf32>, vector<32x256xf32> -> vector<32x256xf32>
    %56 = vector.broadcast %1 : vector<32x1xf32> to vector<32x256xf32>
    %57 = arith.addf %55, %56 : vector<32x256xf32>
    %cst_23 = arith.constant 0.000000e+00 : f32
    %58 = vector.broadcast %cst_23 : f32 to vector<32x256xf32>
    %59 = arith.maximumf %57, %58 : vector<32x256xf32>
    %cst_24 = arith.constant dense<0.000000e+00> : vector<1x32xf32>
    %60 = tpu.matmul %2, %59, %cst_24 {dimension_numbers = #tpu.dot_dimension_numbers<[1], [1], [0], [0], [0, 0, 1, 0], [], []>} : vector<1x256xf32>, vector<32x256xf32>, vector<1x32xf32> -> vector<1x32xf32>
    %c3_i32 = arith.constant 3 : i32
    %61 = vector.broadcast %c3_i32 : i32 to vector<8x1xi32>
    %62 = arith.cmpi eq, %3, %61 : vector<8x1xi32>
    %63 = arith.extui %62 : vector<8x1xi1> to vector<8x1xi32>
    %64 = arith.sitofp %63 : vector<8x1xi32> to vector<8x1xf32>
    %65 = vector.broadcast %60 : vector<1x32xf32> to vector<8x32xf32>
    %66 = vector.broadcast %64 : vector<8x1xf32> to vector<8x32xf32>
    %67 = arith.mulf %65, %66 : vector<8x32xf32>
    %68 = arith.addf %52, %67 : vector<8x32xf32>
    %c4 = arith.constant 4 : index
    %c0_25 = arith.constant 0 : index
    %c0_26 = arith.constant 0 : index
    %69 = vector.load %arg1[%c4, %c0_25, %c0_26] : memref<8x4x256xf32, #tpu.memory_space<vmem>>, vector<1x4x256xf32>
    %70 = vector.shape_cast %69 : vector<1x4x256xf32> to vector<4x256xf32>
    %cst_27 = arith.constant dense<0.000000e+00> : vector<32x256xf32>
    %71 = tpu.matmul %0, %70, %cst_27 {dimension_numbers = #tpu.dot_dimension_numbers<[1], [0], [0], [1], [0, 0, 1, 1], [], []>} : vector<32x4xf32>, vector<4x256xf32>, vector<32x256xf32> -> vector<32x256xf32>
    %72 = vector.broadcast %1 : vector<32x1xf32> to vector<32x256xf32>
    %73 = arith.addf %71, %72 : vector<32x256xf32>
    %cst_28 = arith.constant 0.000000e+00 : f32
    %74 = vector.broadcast %cst_28 : f32 to vector<32x256xf32>
    %75 = arith.maximumf %73, %74 : vector<32x256xf32>
    %cst_29 = arith.constant dense<0.000000e+00> : vector<1x32xf32>
    %76 = tpu.matmul %2, %75, %cst_29 {dimension_numbers = #tpu.dot_dimension_numbers<[1], [1], [0], [0], [0, 0, 1, 0], [], []>} : vector<1x256xf32>, vector<32x256xf32>, vector<1x32xf32> -> vector<1x32xf32>
    %c4_i32 = arith.constant 4 : i32
    %77 = vector.broadcast %c4_i32 : i32 to vector<8x1xi32>
    %78 = arith.cmpi eq, %3, %77 : vector<8x1xi32>
    %79 = arith.extui %78 : vector<8x1xi1> to vector<8x1xi32>
    %80 = arith.sitofp %79 : vector<8x1xi32> to vector<8x1xf32>
    %81 = vector.broadcast %76 : vector<1x32xf32> to vector<8x32xf32>
    %82 = vector.broadcast %80 : vector<8x1xf32> to vector<8x32xf32>
    %83 = arith.mulf %81, %82 : vector<8x32xf32>
    %84 = arith.addf %68, %83 : vector<8x32xf32>
    %c5 = arith.constant 5 : index
    %c0_30 = arith.constant 0 : index
    %c0_31 = arith.constant 0 : index
    %85 = vector.load %arg1[%c5, %c0_30, %c0_31] : memref<8x4x256xf32, #tpu.memory_space<vmem>>, vector<1x4x256xf32>
    %86 = vector.shape_cast %85 : vector<1x4x256xf32> to vector<4x256xf32>
    %cst_32 = arith.constant dense<0.000000e+00> : vector<32x256xf32>
    %87 = tpu.matmul %0, %86, %cst_32 {dimension_numbers = #tpu.dot_dimension_numbers<[1], [0], [0], [1], [0, 0, 1, 1], [], []>} : vector<32x4xf32>, vector<4x256xf32>, vector<32x256xf32> -> vector<32x256xf32>
    %88 = vector.broadcast %1 : vector<32x1xf32> to vector<32x256xf32>
    %89 = arith.addf %87, %88 : vector<32x256xf32>
    %cst_33 = arith.constant 0.000000e+00 : f32
    %90 = vector.broadcast %cst_33 : f32 to vector<32x256xf32>
    %91 = arith.maximumf %89, %90 : vector<32x256xf32>
    %cst_34 = arith.constant dense<0.000000e+00> : vector<1x32xf32>
    %92 = tpu.matmul %2, %91, %cst_34 {dimension_numbers = #tpu.dot_dimension_numbers<[1], [1], [0], [0], [0, 0, 1, 0], [], []>} : vector<1x256xf32>, vector<32x256xf32>, vector<1x32xf32> -> vector<1x32xf32>
    %c5_i32 = arith.constant 5 : i32
    %93 = vector.broadcast %c5_i32 : i32 to vector<8x1xi32>
    %94 = arith.cmpi eq, %3, %93 : vector<8x1xi32>
    %95 = arith.extui %94 : vector<8x1xi1> to vector<8x1xi32>
    %96 = arith.sitofp %95 : vector<8x1xi32> to vector<8x1xf32>
    %97 = vector.broadcast %92 : vector<1x32xf32> to vector<8x32xf32>
    %98 = vector.broadcast %96 : vector<8x1xf32> to vector<8x32xf32>
    %99 = arith.mulf %97, %98 : vector<8x32xf32>
    %100 = arith.addf %84, %99 : vector<8x32xf32>
    %c6 = arith.constant 6 : index
    %c0_35 = arith.constant 0 : index
    %c0_36 = arith.constant 0 : index
    %101 = vector.load %arg1[%c6, %c0_35, %c0_36] : memref<8x4x256xf32, #tpu.memory_space<vmem>>, vector<1x4x256xf32>
    %102 = vector.shape_cast %101 : vector<1x4x256xf32> to vector<4x256xf32>
    %cst_37 = arith.constant dense<0.000000e+00> : vector<32x256xf32>
    %103 = tpu.matmul %0, %102, %cst_37 {dimension_numbers = #tpu.dot_dimension_numbers<[1], [0], [0], [1], [0, 0, 1, 1], [], []>} : vector<32x4xf32>, vector<4x256xf32>, vector<32x256xf32> -> vector<32x256xf32>
    %104 = vector.broadcast %1 : vector<32x1xf32> to vector<32x256xf32>
    %105 = arith.addf %103, %104 : vector<32x256xf32>
    %cst_38 = arith.constant 0.000000e+00 : f32
    %106 = vector.broadcast %cst_38 : f32 to vector<32x256xf32>
    %107 = arith.maximumf %105, %106 : vector<32x256xf32>
    %cst_39 = arith.constant dense<0.000000e+00> : vector<1x32xf32>
    %108 = tpu.matmul %2, %107, %cst_39 {dimension_numbers = #tpu.dot_dimension_numbers<[1], [1], [0], [0], [0, 0, 1, 0], [], []>} : vector<1x256xf32>, vector<32x256xf32>, vector<1x32xf32> -> vector<1x32xf32>
    %c6_i32 = arith.constant 6 : i32
    %109 = vector.broadcast %c6_i32 : i32 to vector<8x1xi32>
    %110 = arith.cmpi eq, %3, %109 : vector<8x1xi32>
    %111 = arith.extui %110 : vector<8x1xi1> to vector<8x1xi32>
    %112 = arith.sitofp %111 : vector<8x1xi32> to vector<8x1xf32>
    %113 = vector.broadcast %108 : vector<1x32xf32> to vector<8x32xf32>
    %114 = vector.broadcast %112 : vector<8x1xf32> to vector<8x32xf32>
    %115 = arith.mulf %113, %114 : vector<8x32xf32>
    %116 = arith.addf %100, %115 : vector<8x32xf32>
    %c7 = arith.constant 7 : index
    %c0_40 = arith.constant 0 : index
    %c0_41 = arith.constant 0 : index
    %117 = vector.load %arg1[%c7, %c0_40, %c0_41] : memref<8x4x256xf32, #tpu.memory_space<vmem>>, vector<1x4x256xf32>
    %118 = vector.shape_cast %117 : vector<1x4x256xf32> to vector<4x256xf32>
    %cst_42 = arith.constant dense<0.000000e+00> : vector<32x256xf32>
    %119 = tpu.matmul %0, %118, %cst_42 {dimension_numbers = #tpu.dot_dimension_numbers<[1], [0], [0], [1], [0, 0, 1, 1], [], []>} : vector<32x4xf32>, vector<4x256xf32>, vector<32x256xf32> -> vector<32x256xf32>
    %120 = vector.broadcast %1 : vector<32x1xf32> to vector<32x256xf32>
    %121 = arith.addf %119, %120 : vector<32x256xf32>
    %cst_43 = arith.constant 0.000000e+00 : f32
    %122 = vector.broadcast %cst_43 : f32 to vector<32x256xf32>
    %123 = arith.maximumf %121, %122 : vector<32x256xf32>
    %cst_44 = arith.constant dense<0.000000e+00> : vector<1x32xf32>
    %124 = tpu.matmul %2, %123, %cst_44 {dimension_numbers = #tpu.dot_dimension_numbers<[1], [1], [0], [0], [0, 0, 1, 0], [], []>} : vector<1x256xf32>, vector<32x256xf32>, vector<1x32xf32> -> vector<1x32xf32>
    %c7_i32 = arith.constant 7 : i32
    %125 = vector.broadcast %c7_i32 : i32 to vector<8x1xi32>
    %126 = arith.cmpi eq, %3, %125 : vector<8x1xi32>
    %127 = arith.extui %126 : vector<8x1xi1> to vector<8x1xi32>
    %128 = arith.sitofp %127 : vector<8x1xi32> to vector<8x1xf32>
    %129 = vector.broadcast %124 : vector<1x32xf32> to vector<8x32xf32>
    %130 = vector.broadcast %128 : vector<8x1xf32> to vector<8x32xf32>
    %131 = arith.mulf %129, %130 : vector<8x32xf32>
    %132 = arith.addf %116, %131 : vector<8x32xf32>
    %c0_45 = arith.constant 0 : index
    %c0_46 = arith.constant 0 : index
    %133 = vector.load %arg9[%c0_45, %c0_46] : memref<8x32xf32, #tpu.memory_space<vmem>>, vector<8x32xf32>
    tpu.vector_store %arg9[%c0_45, %c0_46], %132 {strides = array<i32>} : memref<8x32xf32, #tpu.memory_space<vmem>>, vector<8x32xf32>,
    %c0_47 = arith.constant 0 : index
    %c0_48 = arith.constant 0 : index
    %134 = vector.load %arg4[%c0_47, %c0_48] : memref<32x32xf32, #tpu.memory_space<vmem>>, vector<32x32xf32>
    %cst_49 = arith.constant dense<0.000000e+00> : vector<8x32xf32>
    %135 = tpu.matmul %132, %134, %cst_49 {dimension_numbers = #tpu.dot_dimension_numbers<[1], [0], [0], [1], [0, 0, 1, 1], [], []>} : vector<8x32xf32>, vector<32x32xf32>, vector<8x32xf32> -> vector<8x32xf32>
    %c0_50 = arith.constant 0 : index
    %c0_51 = arith.constant 0 : index
    %136 = vector.load %arg5[%c0_50, %c0_51] : memref<1x32xf32, #tpu.memory_space<vmem>>, vector<1x32xf32>
    %137 = vector.broadcast %136 : vector<1x32xf32> to vector<8x32xf32>
    %138 = arith.addf %135, %137 : vector<8x32xf32>
    %cst_52 = arith.constant 0.000000e+00 : f32
    %139 = vector.broadcast %cst_52 : f32 to vector<8x32xf32>
    %140 = arith.maximumf %138, %139 : vector<8x32xf32>
    %c0_53 = arith.constant 0 : index
    %c0_54 = arith.constant 0 : index
    %141 = vector.load %arg6[%c0_53, %c0_54] : memref<32x128xf32, #tpu.memory_space<vmem>>, vector<32x128xf32>
    %cst_55 = arith.constant dense<0.000000e+00> : vector<8x128xf32>
    %142 = tpu.matmul %140, %141, %cst_55 {dimension_numbers = #tpu.dot_dimension_numbers<[1], [0], [0], [1], [0, 0, 1, 1], [], []>} : vector<8x32xf32>, vector<32x128xf32>, vector<8x128xf32> -> vector<8x128xf32>
    %c0_56 = arith.constant 0 : index
    %c0_57 = arith.constant 0 : index
    %143 = vector.load %arg7[%c0_56, %c0_57] : memref<1x128xf32, #tpu.memory_space<vmem>>, vector<1x128xf32>
    %144 = vector.broadcast %143 : vector<1x128xf32> to vector<8x128xf32>
    %145 = arith.addf %142, %144 : vector<8x128xf32>
    %c0_58 = arith.constant 0 : index
    %c0_59 = arith.constant 0 : index
    %146 = vector.load %arg8[%c0_58, %c0_59] : memref<8x128xf32, #tpu.memory_space<vmem>>, vector<8x128xf32>
    tpu.vector_store %arg8[%c0_58, %c0_59], %145 {strides = array<i32>} : memref<8x128xf32, #tpu.memory_space<vmem>>, vector<8x128xf32>,
    return
  }
  func.func @transform_0(%arg0: i32) -> (i32, i32, i32) {
    %c0_i32 = arith.constant 0 : i32
    %c0_i32_0 = arith.constant 0 : i32
    %c0_i32_1 = arith.constant 0 : i32
    return %arg0, %c0_i32, %c0_i32_0 : i32, i32, i32
  }
  func.func @transform_1(%arg0: i32) -> (i32, i32) {
    %c0_i32 = arith.constant 0 : i32
    %c0_i32_0 = arith.constant 0 : i32
    %c0_i32_1 = arith.constant 0 : i32
    return %c0_i32, %c0_i32_0 : i32, i32
  }
  func.func @transform_2(%arg0: i32) -> (i32, i32) {
    %c0_i32 = arith.constant 0 : i32
    %c0_i32_0 = arith.constant 0 : i32
    %c0_i32_1 = arith.constant 0 : i32
    return %c0_i32, %c0_i32_0 : i32, i32
  }
  func.func @transform_3(%arg0: i32) -> (i32, i32) {
    %c0_i32 = arith.constant 0 : i32
    %c0_i32_0 = arith.constant 0 : i32
    %c0_i32_1 = arith.constant 0 : i32
    return %c0_i32, %c0_i32_0 : i32, i32
  }
  func.func @transform_4(%arg0: i32) -> (i32, i32) {
    %c0_i32 = arith.constant 0 : i32
    %c0_i32_0 = arith.constant 0 : i32
    %c0_i32_1 = arith.constant 0 : i32
    return %c0_i32, %c0_i32_0 : i32, i32
  }
  func.func @transform_5(%arg0: i32) -> (i32, i32) {
    %c0_i32 = arith.constant 0 : i32
    %c0_i32_0 = arith.constant 0 : i32
    %c0_i32_1 = arith.constant 0 : i32
    return %c0_i32, %c0_i32_0 : i32, i32
  }
  func.func @transform_6(%arg0: i32) -> (i32, i32) {
    %c0_i32 = arith.constant 0 : i32
    %c0_i32_0 = arith.constant 0 : i32
    %c0_i32_1 = arith.constant 0 : i32
    return %c0_i32, %c0_i32_0 : i32, i32
  }
  func.func @transform_7(%arg0: i32) -> (i32, i32) {
    %c0_i32 = arith.constant 0 : i32
    %c0_i32_0 = arith.constant 0 : i32
    return %arg0, %c0_i32 : i32, i32
  }
  func.func @transform_8(%arg0: i32) -> (i32, i32) {
    %c0_i32 = arith.constant 0 : i32
    %c0_i32_0 = arith.constant 0 : i32
    return %arg0, %c0_i32 : i32, i32
  }
}

</mosaic_0001>

<bundles_post_ra>
// kernel: _simclr_pallas.1
= control target key start
LH: loop header
LB: loop body
LE: loop exit
PB: predicated region body
PF: predicated region fallthrough
CT: control target
= control target key end

     0   :  { %vm74_vm0 = vcmask 1043456   ;;  %v1913_v2 = vmov 0.0   ;;  %v1914_v5 = vmov 0   ;;  %vm61_vm1 = vcmask 31744   ;;  %s2289_s0 = inlined_call_operand.vmem [shape: f32[8,4,256], index: 0, kind: input, shape index: {}]   ;;  %s2290_s1 = inlined_call_operand.vmem [shape: f32[32,4], index: 1, kind: input, shape index: {}]   ;;  %s2291_s2 = inlined_call_operand.vmem [shape: f32[32,1], index: 2, kind: input, shape index: {}]   ;;  %s2292_s3 = inlined_call_operand.vmem [shape: f32[32,32], index: 3, kind: input, shape index: {}]   ;;  %s2293_s5 = inlined_call_operand.vmem [shape: f32[32,128], index: 5, kind: input, shape index: {}]   ;;  %s2294_s8 = inlined_call_operand.vmem [shape: f32[8,32], index: 8, kind: output, shape index: {1}]   ;;  %s2295_s4 = inlined_call_operand.vmem [shape: f32[1,32], index: 4, kind: input, shape index: {}]   ;;  %s2296_s6 = inlined_call_operand.vmem [shape: f32[1,128], index: 6, kind: input, shape index: {}]   ;;  %s2297_s7 = inlined_call_operand.vmem [shape: f32[8,128], index: 7, kind: output, shape index: {0}]  }
   0x1   :  { %v38_v0 = vld [vmem:[%s2289_s0] sm:$0xff]  ;;  %v1730_v1 = vld [vmem:[%s2289_s0 + $0x8] sm:$0xff]  ;;  %143 = vmatprep.mubr.f32.mxu0 %v1913_v2  ;;  %327 = vmatprep.mubr.f32.mxu1 %v1913_v2  ;;  %v34_v8 = vld [vmem:[%s2291_s2 + $0x10] sm:$0xff]  ;;  %v1915_v14 = vmov 0.00390625   ;;  %vm1917_vm4 = vmmov 0   ;;  %vm1543_vm11 = vcmask 261120  }
   0x2   :  { %v60_v3 = vcombine.high %v38_v0, %v38_v0  ;;  %v258_v4 = vcombine.high %v1730_v1, %v1730_v1  ;;  %1903 = vset.pattern.permute.xlu0 %v1914_v5  ;;  %1904 = vset.pattern.permute.xlu1 %v1914_v5  ;;  %v1974_v6 = vld [vmem:[%s2290_s1] sm:$0xff]  ;;  %v1995_v9 = vld [vmem:[%s2290_s1 + $0x8] sm:$0xff]  ;;  %v35_v11 = vld [vmem:[%s2291_s2 + $0x18] sm:$0xff] }
   0x3   :  { %v32_v7 = vld [vmem:[%s2291_s2] sm:$0xff]  ;;  %51 = vperm.xlu1 %1904, %v34_v8   ;;  %v33_v10 = vld [vmem:[%s2291_s2 + $0x8] sm:$0xff]  ;;  %v2012_v12 = vld [vmem:[%s2290_s1 + $0x10] sm:$0xff] }
   0x4   :  { %1723 = vmatprep.subr.msk.mxu0 %vm74_vm0, %v60_v3  ;;  %1731 = vmatprep.subr.msk.mxu1 %vm74_vm0, %v258_v4  ;;  %v2023_v13 = vld [vmem:[%s2290_s1 + $0x18] sm:$0xff]  ;;  %v1738_v4 = vld [vmem:[%s2289_s0 + $0x10] sm:$0xff] }
   0x5   :  { %1724 = vmatpush1.msk.msra.mxu0 %vm74_vm0, %v38_v0  ;;  %1732 = vmatpush1.msk.msra.mxu1 %vm74_vm0, %v1730_v1 }
   0x6   :  { %1725 = vmatmul.mubr.msk.f32.vlgmr.msra.gmra.mrb[0].mxu0 %vm61_vm1, %v1974_v6  ;;  %1733 = vmatmul.mubr.msk.f32.vlgmr.msra.gmra.mrb[0].mxu1 %vm61_vm1, %v1974_v6 }
   0x7   :  { %149 = vmatprep.mubr.f32.mxu0 %v1913_v2  ;;  %333 = vmatprep.mubr.f32.mxu1 %v1913_v2 }
   0x8   :  { %41 = vperm.xlu0 %1903, %v32_v7   ;;  %56 = vperm.xlu1 %1904, %v35_v11  }
   0xa   :  { %1726 = vmatmul.mubr.msk.f32.gmra.mrb[2].mxu0 %vm61_vm1, %v1995_v9  ;;  %1734 = vmatmul.mubr.msk.f32.gmra.mrb[2].mxu1 %vm61_vm1, %v1995_v9 }
   0xb   :  { %155 = vmatprep.mubr.f32.mxu0 %v1913_v2  ;;  %339 = vmatprep.mubr.f32.mxu1 %v1913_v2 }
   0xc   :  { %46 = vperm.xlu0 %1903, %v33_v10  }
   0xe   :  { %1727 = vmatmul.mubr.msk.f32.gmra.mrb[4].mxu0 %vm61_vm1, %v2012_v12  ;;  %1735 = vmatmul.mubr.msk.f32.gmra.mrb[4].mxu1 %vm61_vm1, %v2012_v12 }
   0xf   :  { %161 = vmatprep.mubr.f32.mxu0 %v1913_v2  ;;  %345 = vmatprep.mubr.f32.mxu1 %v1913_v2 }
  0x12   :  { %1728 = vmatmul.mubr.msk.f32.gmra.mrb[6].mxu0 %vm61_vm1, %v2023_v13  ;;  %1736 = vmatmul.mubr.msk.f32.gmra.mrb[6].mxu1 %vm61_vm1, %v2023_v13 }
  0x13   :  { %240 = vmatprep.mubr.f32.mxu0 %v1915_v14  ;;  %424 = vmatprep.mubr.f32.mxu1 %v1915_v14 }
  0x82   :  { %v2037_v23 = vpop.permute.xlu1 %51 }
  0x87   :  { %v2031_v15 = vpop.permute.xlu0 %41  ;;  %v2047_v52 = vpop.permute.xlu1 %56 }
  0x8b   :  { %v2035_v22 = vpop.permute.xlu0 %46 }
  0xd9   :  { %v145_v16 = vpop.f32.mrb[0].mxu0  ;;  %v329_v17 = vpop.f32.mrb[0].mxu1 }
  0xda   :  { %v147_v18 = vpop.f32.mrb[1].mxu0  ;;  %v331_v19 = vpop.f32.mrb[1].mxu1  ;;  %v146_v20 = vadd.f32 %v145_v16, %v2031_v15  ;;  %v330_v21 = vadd.f32 %v329_v17, %v2031_v15 }
  0xdb   :  { %v148_v24 = vadd.f32 %v147_v18, %v2031_v15  ;;  %v332_v25 = vadd.f32 %v331_v19, %v2031_v15  ;;  %v442_v19 = vcombine.high %v1738_v4, %v1738_v4 }
  0xdc   :  { %v168_v34 = vmax.f32 %v146_v20, 0.0  ;;  %v352_v35 = vmax.f32 %v330_v21, 0.0  ;;  %v1746_v20 = vld [vmem:[%s2289_s0 + $0x18] sm:$0xff] }
  0xdd   :  { %v151_v26 = vpop.f32.mrb[2].mxu0  ;;  %v335_v27 = vpop.f32.mrb[2].mxu1  ;;  %v169_v38 = vmax.f32 %v148_v24, 0.0  ;;  %v353_v39 = vmax.f32 %v332_v25, 0.0  ;;  %v626_v21 = vcombine.high %v1746_v20, %v1746_v20  ;;  %v1754_v24 = vld [vmem:[%s2289_s0 + $0x20] sm:$0xff] }
  0xde   :  { %v152_v28 = vadd.f32 %v151_v26, %v2035_v22  ;;  %v336_v29 = vadd.f32 %v335_v27, %v2035_v22  ;;  %v153_v30 = vpop.f32.mrb[3].mxu0  ;;  %v337_v31 = vpop.f32.mrb[3].mxu1  ;;  %v810_v25 = vcombine.high %v1754_v24, %v1754_v24  ;;  %v1762_v26 = vld [vmem:[%s2289_s0 + $0x28] sm:$0xff] }
  0xdf   :  { %v154_v32 = vadd.f32 %v153_v30, %v2035_v22  ;;  %v338_v33 = vadd.f32 %v337_v31, %v2035_v22  ;;  %v994_v27 = vcombine.high %v1762_v26, %v1762_v26  ;;  %v1778_v30 = vld [vmem:[%s2289_s0 + $0x38] sm:$0xff] }
  0xe0   :  { %v170_v36 = vmax.f32 %v152_v28, 0.0  ;;  %v354_v37 = vmax.f32 %v336_v29, 0.0  ;;  %v1770_v28 = vld [vmem:[%s2289_s0 + $0x30] sm:$0xff]  ;;  %v1362_v31 = vcombine.high %v1778_v30, %v1778_v30 }
  0xe1   :  { %v171_v40 = vmax.f32 %v154_v32, 0.0  ;;  %v355_v41 = vmax.f32 %v338_v33, 0.0  ;;  %v157_v42 = vpop.f32.mrb[4].mxu0  ;;  %v341_v43 = vpop.f32.mrb[4].mxu1  ;;  %v1178_v29 = vcombine.high %v1770_v28, %v1770_v28  ;;  %v36_v32 = vlaneseq }
  0xe2   :  { %v1824_v44 = vpack.c.bf16 %v170_v36, %v168_v34  ;;  %v1832_v45 = vpack.c.bf16 %v354_v37, %v352_v35  ;;  %v159_v46 = vpop.f32.mrb[5].mxu0  ;;  %v343_v47 = vpop.f32.mrb[5].mxu1  ;;  %v158_v50 = vadd.f32 %v157_v42, %v2037_v23  ;;  %v342_v51 = vadd.f32 %v341_v43, %v2037_v23 }
  0xe3   :  { %v1822_v48 = vpack.c.bf16 %v171_v40, %v169_v38  ;;  %v1830_v49 = vpack.c.bf16 %v355_v41, %v353_v39  ;;  %v160_v53 = vadd.f32 %v159_v46, %v2037_v23  ;;  %v344_v54 = vadd.f32 %v343_v47, %v2037_v23 }
  0xe4   :  { %v172_v63 = vmax.f32 %v158_v50, 0.0  ;;  %v356_v0 = vmax.f32 %v342_v51, 0.0  ;;  %v2160_v33 = vshrl.u32 %v36_v32, 7 }
  0xe5   :  { %v163_v55 = vpop.f32.mrb[6].mxu0  ;;  %1823 = vmatprep.subr.bf16.mxu0 %v1822_v48  ;;  %v347_v56 = vpop.f32.mrb[6].mxu1  ;;  %1831 = vmatprep.subr.bf16.mxu1 %v1830_v49  ;;  %v173_v5 = vmax.f32 %v160_v53, 0.0  ;;  %v357_v7 = vmax.f32 %v344_v54, 0.0 }
  0xe6   :  { %v164_v57 = vadd.f32 %v163_v55, %v2047_v52  ;;  %v348_v58 = vadd.f32 %v347_v56, %v2047_v52  ;;  %v165_v59 = vpop.f32.mrb[7].mxu0  ;;  %1825 = vmatpush1.bf16.xpose.msra.mxu0 %v1824_v44  ;;  %v349_v60 = vpop.f32.mrb[7].mxu1  ;;  %1833 = vmatpush1.bf16.xpose.msra.mxu1 %v1832_v45  ;;  %vm246_vm2 = vcmp.eq.s32.totalorder %v2160_v33, 0  ;;  %vm430_vm3 = vcmp.eq.s32.totalorder %v2160_v33, 1 }
  0xe7   :  { %v166_v61 = vadd.f32 %v165_v59, %v2047_v52  ;;  %v350_v62 = vadd.f32 %v349_v60, %v2047_v52  ;;  %v1729_v34 = vsel %vm246_vm2, 1.0, %v1913_v2  ;;  %vm614_vm5 = vcmp.eq.s32.totalorder %v2160_v33, 2 }
  0xe8   :  { %v174_v1 = vmax.f32 %v164_v57, 0.0  ;;  %v358_v3 = vmax.f32 %v348_v58, 0.0  ;;  %vm798_vm6 = vcmp.eq.s32.totalorder %v2160_v33, 3  ;;  %vm982_vm7 = vcmp.eq.s32.totalorder %v2160_v33, 4 }
  0xe9   :  { %v175_v8 = vmax.f32 %v166_v61, 0.0  ;;  %v359_v10 = vmax.f32 %v350_v62, 0.0  ;;  %vm1166_vm8 = vcmp.eq.s32.totalorder %v2160_v33, 5  ;;  %vm1350_vm9 = vcmp.eq.s32.totalorder %v2160_v33, 6 }
  0xea   :  { %v1828_v11 = vpack.c.bf16 %v174_v1, %v172_v63  ;;  %v1836_v16 = vpack.c.bf16 %v358_v3, %v356_v0  ;;  %vm1534_vm10 = vcmp.eq.s32.totalorder %v2160_v33, 7 }
  0xeb   :  { %v1826_v17 = vpack.c.bf16 %v175_v8, %v173_v5  ;;  %v1834_v18 = vpack.c.bf16 %v359_v10, %v357_v7 }
  0xed   :  { %1827 = vmatprep.subr.bf16.mxu0 %v1826_v17  ;;  %1835 = vmatprep.subr.bf16.mxu1 %v1834_v18 }
  0xee   :  { %1829 = vmatpush1.bf16.xpose.msra.mxu0 %v1828_v11  ;;  %1837 = vmatpush1.bf16.xpose.msra.mxu1 %v1836_v16 }
  0xef   :  { %1739 = vmatprep.subr.msk.mxu0 %vm74_vm0, %v442_v19 }
  0xf5   :  { %241 = vmatmul.mubr.f32.vlgmr.msra.gmra.mrb[8].mxu0 %v1915_v14  ;;  %425 = vmatmul.mubr.f32.vlgmr.msra.gmra.mrb[8].mxu1 %v1915_v14 }
  0xf6   :  { %1740 = vmatpush1.msk.msra.mxu0 %vm74_vm0, %v1738_v4  ;;  %511 = vmatprep.mubr.f32.mxu0 %v1913_v2 }
  0xf7   :  { %1747 = vmatprep.subr.msk.mxu0 %vm74_vm0, %v626_v21  ;;  %608 = vmatprep.mubr.f32.mxu1 %v1915_v14 }
  0xf9   :  { %1741 = vmatmul.mubr.msk.f32.vlgmr.msra.gmra.mrb[10].mxu0 %vm61_vm1, %v1974_v6 }
  0xfa   :  { %1748 = vmatpush1.msk.msra.mxu0 %vm74_vm0, %v1746_v20  ;;  %517 = vmatprep.mubr.f32.mxu0 %v1913_v2 }
  0xfb   :  { %1755 = vmatprep.subr.msk.mxu0 %vm74_vm0, %v810_v25 }
  0xfd   :  { %1742 = vmatmul.mubr.msk.f32.gmra.mrb[12].mxu0 %vm61_vm1, %v1995_v9 }
  0xfe   :  { %523 = vmatprep.mubr.f32.mxu0 %v1913_v2 }
 0x101   :  { %1743 = vmatmul.mubr.msk.f32.gmra.mrb[14].mxu0 %vm61_vm1, %v2012_v12 }
 0x102   :  { %529 = vmatprep.mubr.f32.mxu0 %v1913_v2 }
 0x105   :  { %1744 = vmatmul.mubr.msk.f32.gmra.mrb[16].mxu0 %vm61_vm1, %v2023_v13 }
 0x106   :  { %695 = vmatprep.mubr.f32.mxu0 %v1913_v2 }
 0x109   :  { %1749 = vmatmul.mubr.msk.f32.vlgmr.msra.gmra.mrb[18].mxu0 %vm61_vm1, %v1974_v6 }
 0x10a   :  { %1756 = vmatpush1.msk.msra.mxu0 %vm74_vm0, %v1754_v24  ;;  %701 = vmatprep.mubr.f32.mxu0 %v1913_v2 }
 0x10b   :  { %1763 = vmatprep.subr.msk.mxu0 %vm74_vm0, %v994_v27 }
 0x10d   :  { %1750 = vmatmul.mubr.msk.f32.gmra.mrb[20].mxu0 %vm61_vm1, %v1995_v9 }
 0x10e   :  { %707 = vmatprep.mubr.f32.mxu0 %v1913_v2 }
 0x111   :  { %1751 = vmatmul.mubr.msk.f32.gmra.mrb[22].mxu0 %vm61_vm1, %v2012_v12 }
 0x112   :  { %713 = vmatprep.mubr.f32.mxu0 %v1913_v2 }
 0x115   :  { %1752 = vmatmul.mubr.msk.f32.gmra.mrb[24].mxu0 %vm61_vm1, %v2023_v13 }
 0x116   :  { %879 = vmatprep.mubr.f32.mxu0 %v1913_v2 }
 0x119   :  { %1757 = vmatmul.mubr.msk.f32.vlgmr.msra.gmra.mrb[26].mxu0 %vm61_vm1, %v1974_v6 }
 0x11a   :  { %1764 = vmatpush1.msk.msra.mxu0 %vm74_vm0, %v1762_v26  ;;  %885 = vmatprep.mubr.f32.mxu0 %v1913_v2 }
 0x11b   :  { %1771 = vmatprep.subr.msk.mxu0 %vm74_vm0, %v1178_v29 }
 0x11d   :  { %1758 = vmatmul.mubr.msk.f32.gmra.mrb[28].mxu0 %vm61_vm1, %v1995_v9 }
 0x11e   :  { %891 = vmatprep.mubr.f32.mxu0 %v1913_v2 }
 0x121   :  { %1759 = vmatmul.mubr.msk.f32.gmra.mrb[30].mxu0 %vm61_vm1, %v2012_v12 }
 0x122   :  { %897 = vmatprep.mubr.f32.mxu0 %v1913_v2 }
 0x125   :  { %1760 = vmatmul.mubr.msk.f32.gmra.mrb[32].mxu0 %vm61_vm1, %v2023_v13 }
 0x126   :  { %1063 = vmatprep.mubr.f32.mxu0 %v1913_v2 }
 0x129   :  { %1765 = vmatmul.mubr.msk.f32.vlgmr.msra.gmra.mrb[34].mxu0 %vm61_vm1, %v1974_v6 }
 0x12a   :  { %1772 = vmatpush1.msk.msra.mxu0 %vm74_vm0, %v1770_v28  ;;  %1069 = vmatprep.mubr.f32.mxu0 %v1913_v2 }
 0x12b   :  { %1779 = vmatprep.subr.msk.mxu0 %vm74_vm0, %v1362_v31 }
 0x12d   :  { %1766 = vmatmul.mubr.msk.f32.gmra.mrb[36].mxu0 %vm61_vm1, %v1995_v9 }
 0x12e   :  { %1075 = vmatprep.mubr.f32.mxu0 %v1913_v2 }
 0x131   :  { %1767 = vmatmul.mubr.msk.f32.gmra.mrb[38].mxu0 %vm61_vm1, %v2012_v12 }
 0x132   :  { %1081 = vmatprep.mubr.f32.mxu0 %v1913_v2 }
 0x135   :  { %1768 = vmatmul.mubr.msk.f32.gmra.mrb[40].mxu0 %vm61_vm1, %v2023_v13 }
 0x136   :  { %1247 = vmatprep.mubr.f32.mxu0 %v1913_v2 }
 0x139   :  { %1773 = vmatmul.mubr.msk.f32.vlgmr.msra.gmra.mrb[42].mxu0 %vm61_vm1, %v1974_v6 }
 0x13a   :  { %1780 = vmatpush1.msk.msra.mxu0 %vm74_vm0, %v1778_v30  ;;  %1253 = vmatprep.mubr.f32.mxu0 %v1913_v2 }
 0x13d   :  { %1774 = vmatmul.mubr.msk.f32.gmra.mrb[44].mxu0 %vm61_vm1, %v1995_v9 }
 0x13e   :  { %1259 = vmatprep.mubr.f32.mxu0 %v1913_v2 }
 0x141   :  { %1775 = vmatmul.mubr.msk.f32.gmra.mrb[46].mxu0 %vm61_vm1, %v2012_v12 }
 0x142   :  { %1265 = vmatprep.mubr.f32.mxu0 %v1913_v2 }
 0x145   :  { %1776 = vmatmul.mubr.msk.f32.gmra.mrb[48].mxu0 %vm61_vm1, %v2023_v13 }
 0x146   :  { %1431 = vmatprep.mubr.f32.mxu0 %v1913_v2 }
 0x149   :  { %1781 = vmatmul.mubr.msk.f32.vlgmr.msra.gmra.mrb[50].mxu0 %vm61_vm1, %v1974_v6  ;;  %v2164_v6 = vsub.s32 0, %v2160_v33  ;;  %v1633_v33 = vld [vmem:[%s2293_s5 + $0x18] sm:$0xff] }
 0x14a   :  { %1437 = vmatprep.mubr.f32.mxu0 %v1913_v2 }
 0x14d   :  { %1782 = vmatmul.mubr.msk.f32.gmra.mrb[52].mxu0 %vm61_vm1, %v1995_v9 }
 0x14e   :  { %1443 = vmatprep.mubr.f32.mxu0 %v1913_v2 }
 0x151   :  { %1783 = vmatmul.mubr.msk.f32.gmra.mrb[54].mxu0 %vm61_vm1, %v2012_v12  ;;  %v1737_v12 = vsel %vm430_vm3, 1.0, %v1913_v2 }
 0x152   :  { %1449 = vmatprep.mubr.f32.mxu0 %v1913_v2 }
 0x155   :  { %1784 = vmatmul.mubr.msk.f32.gmra.mrb[56].mxu0 %vm61_vm1, %v2023_v13 }
 0x156   :  { %1808 = vmatprep.mubr.msk.f32.mxu0 %vm1917_vm4, %v1913_v2 }
 0x1c8   :  { %v242_v9 = vpop.f32.mrb[8].mxu0  ;;  %v426_v35 = vpop.f32.mrb[8].mxu1 }
 0x1c9   :  { %v252_v36 = vrot.slane %v242_v9, %v2164_v6  ;;  %v244_v37 = vpop.f32.mrb[9].mxu0  ;;  %v436_v13 = vrot.slane %v426_v35, %v2164_v6  ;;  %v428_v38 = vpop.f32.mrb[9].mxu1 }
 0x1cb   :  { %v253_v39 = vmul.f32 %v1729_v34, %v252_v36  ;;  %v437_v40 = vmul.f32 %v1737_v12, %v436_v13 }
 0x1cc   :  { %v513_v41 = vpop.f32.mrb[10].mxu0 }
 0x1cd   :  { %v2171_v42 = vadd.f32 %v437_v40, %v253_v39  ;;  %v515_v43 = vpop.f32.mrb[11].mxu0  ;;  %v514_v44 = vadd.f32 %v513_v41, %v2031_v15 }
 0x1ce   :  { %v516_v45 = vadd.f32 %v515_v43, %v2031_v15 }
 0x1cf   :  { %v536_v50 = vmax.f32 %v514_v44, 0.0 }
 0x1d0   :  { %v519_v46 = vpop.f32.mrb[12].mxu0  ;;  %v537_v53 = vmax.f32 %v516_v45, 0.0 }
 0x1d1   :  { %v520_v47 = vadd.f32 %v519_v46, %v2035_v22  ;;  %v521_v48 = vpop.f32.mrb[13].mxu0 }
 0x1d2   :  { %v522_v49 = vadd.f32 %v521_v48, %v2035_v22 }
 0x1d3   :  { %v538_v51 = vmax.f32 %v520_v47, 0.0 }
 0x1d4   :  { %v539_v54 = vmax.f32 %v522_v49, 0.0  ;;  %v525_v55 = vpop.f32.mrb[14].mxu0 }
 0x1d5   :  { %v1840_v56 = vpack.c.bf16 %v538_v51, %v536_v50  ;;  %v527_v57 = vpop.f32.mrb[15].mxu0  ;;  %v526_v59 = vadd.f32 %v525_v55, %v2037_v23 }
 0x1d6   :  { %v1838_v58 = vpack.c.bf16 %v539_v54, %v537_v53  ;;  %v528_v60 = vadd.f32 %v527_v57, %v2037_v23 }
 0x1d7   :  { %v540_v1 = vmax.f32 %v526_v59, 0.0 }
 0x1d8   :  { %v531_v61 = vpop.f32.mrb[16].mxu0  ;;  %1839 = vmatprep.subr.bf16.mxu1 %v1838_v58  ;;  %v541_v4 = vmax.f32 %v528_v60, 0.0 }
 0x1d9   :  { %v532_v62 = vadd.f32 %v531_v61, %v2047_v52  ;;  %v533_v63 = vpop.f32.mrb[17].mxu0  ;;  %1841 = vmatpush1.bf16.xpose.msra.mxu1 %v1840_v56 }
 0x1da   :  { %v534_v0 = vadd.f32 %v533_v63, %v2047_v52 }
 0x1db   :  { %v542_v3 = vmax.f32 %v532_v62, 0.0 }
 0x1dc   :  { %v543_v5 = vmax.f32 %v534_v0, 0.0  ;;  %v697_v7 = vpop.f32.mrb[18].mxu0 }
 0x1dd   :  { %v1844_v8 = vpack.c.bf16 %v542_v3, %v540_v1  ;;  %v699_v10 = vpop.f32.mrb[19].mxu0  ;;  %v698_v16 = vadd.f32 %v697_v7, %v2031_v15 }
 0x1de   :  { %v1842_v11 = vpack.c.bf16 %v543_v5, %v541_v4  ;;  %v700_v17 = vadd.f32 %v699_v10, %v2031_v15 }
 0x1df   :  { %v720_v24 = vmax.f32 %v698_v16, 0.0 }
 0x1e0   :  { %1843 = vmatprep.subr.bf16.mxu1 %v1842_v11  ;;  %v703_v18 = vpop.f32.mrb[20].mxu0  ;;  %v721_v26 = vmax.f32 %v700_v17, 0.0 }
 0x1e1   :  { %v704_v19 = vadd.f32 %v703_v18, %v2035_v22  ;;  %1845 = vmatpush1.bf16.xpose.msra.mxu1 %v1844_v8  ;;  %v705_v20 = vpop.f32.mrb[21].mxu0 }
 0x1e2   :  { %v706_v21 = vadd.f32 %v705_v20, %v2035_v22 }
 0x1e3   :  { %v722_v25 = vmax.f32 %v704_v19, 0.0 }
 0x1e4   :  { %v723_v27 = vmax.f32 %v706_v21, 0.0  ;;  %v709_v28 = vpop.f32.mrb[22].mxu0 }
 0x1e5   :  { %v1848_v29 = vpack.c.bf16 %v722_v25, %v720_v24  ;;  %v711_v30 = vpop.f32.mrb[23].mxu0  ;;  %v710_v32 = vadd.f32 %v709_v28, %v2037_v23 }
 0x1e6   :  { %v1846_v31 = vpack.c.bf16 %v723_v27, %v721_v26  ;;  %v712_v9 = vadd.f32 %v711_v30, %v2037_v23 }
 0x1e7   :  { %v724_v37 = vmax.f32 %v710_v32, 0.0 }
 0x1e8   :  { %609 = vmatmul.mubr.f32.vlgmr.msra.gmra.mrb[10].mxu1 %v1915_v14  ;;  %v715_v34 = vpop.f32.mrb[24].mxu0  ;;  %1847 = vmatprep.subr.bf16.mxu1 %v1846_v31  ;;  %v725_v38 = vmax.f32 %v712_v9, 0.0 }
 0x1e9   :  { %v716_v35 = vadd.f32 %v715_v34, %v2047_v52  ;;  %v717_v12 = vpop.f32.mrb[25].mxu0  ;;  %1849 = vmatpush1.bf16.xpose.msra.mxu1 %v1848_v29  ;;  %792 = vmatprep.mubr.f32.mxu1 %v1915_v14 }
 0x1ea   :  { %v718_v36 = vadd.f32 %v717_v12, %v2047_v52 }
 0x1eb   :  { %v726_v13 = vmax.f32 %v716_v35, 0.0 }
 0x1ec   :  { %v727_v39 = vmax.f32 %v718_v36, 0.0  ;;  %v881_v40 = vpop.f32.mrb[26].mxu0 }
 0x1ed   :  { %v1852_v41 = vpack.c.bf16 %v726_v13, %v724_v37  ;;  %v883_v43 = vpop.f32.mrb[27].mxu0  ;;  %v882_v45 = vadd.f32 %v881_v40, %v2031_v15 }
 0x1ee   :  { %v1850_v44 = vpack.c.bf16 %v727_v39, %v725_v38  ;;  %v884_v46 = vadd.f32 %v883_v43, %v2031_v15 }
 0x1ef   :  { %v904_v51 = vmax.f32 %v882_v45, 0.0 }
 0x1f0   :  { %1851 = vmatprep.subr.bf16.mxu1 %v1850_v44  ;;  %v887_v47 = vpop.f32.mrb[28].mxu0  ;;  %v905_v54 = vmax.f32 %v884_v46, 0.0 }
 0x1f1   :  { %v888_v48 = vadd.f32 %v887_v47, %v2035_v22  ;;  %1853 = vmatpush1.bf16.xpose.msra.mxu1 %v1852_v41  ;;  %v889_v49 = vpop.f32.mrb[29].mxu0 }
 0x1f2   :  { %v890_v50 = vadd.f32 %v889_v49, %v2035_v22 }
 0x1f3   :  { %v906_v53 = vmax.f32 %v888_v48, 0.0 }
 0x1f4   :  { %v907_v55 = vmax.f32 %v890_v50, 0.0  ;;  %v893_v56 = vpop.f32.mrb[30].mxu0 }
 0x1f5   :  { %v1856_v57 = vpack.c.bf16 %v906_v53, %v904_v51  ;;  %v895_v58 = vpop.f32.mrb[31].mxu0  ;;  %v894_v60 = vadd.f32 %v893_v56, %v2037_v23 }
 0x1f6   :  { %v1854_v59 = vpack.c.bf16 %v907_v55, %v905_v54  ;;  %v896_v61 = vadd.f32 %v895_v58, %v2037_v23 }
 0x1f7   :  { %v908_v3 = vmax.f32 %v894_v60, 0.0 }
 0x1f8   :  { %793 = vmatmul.mubr.f32.vlgmr.msra.gmra.mrb[12].mxu1 %v1915_v14  ;;  %v899_v62 = vpop.f32.mrb[32].mxu0  ;;  %1855 = vmatprep.subr.bf16.mxu1 %v1854_v59  ;;  %v909_v5 = vmax.f32 %v896_v61, 0.0 }
 0x1f9   :  { %v900_v63 = vadd.f32 %v899_v62, %v2047_v52  ;;  %v901_v0 = vpop.f32.mrb[33].mxu0  ;;  %1857 = vmatpush1.bf16.xpose.msra.mxu1 %v1856_v57  ;;  %976 = vmatprep.mubr.f32.mxu1 %v1915_v14 }
 0x1fa   :  { %v902_v1 = vadd.f32 %v901_v0, %v2047_v52 }
 0x1fb   :  { %v910_v4 = vmax.f32 %v900_v63, 0.0 }
 0x1fc   :  { %v911_v7 = vmax.f32 %v902_v1, 0.0  ;;  %v1065_v8 = vpop.f32.mrb[34].mxu0 }
 0x1fd   :  { %v1860_v10 = vpack.c.bf16 %v910_v4, %v908_v3  ;;  %v1067_v11 = vpop.f32.mrb[35].mxu0  ;;  %v1066_v17 = vadd.f32 %v1065_v8, %v2031_v15 }
 0x1fe   :  { %v1858_v16 = vpack.c.bf16 %v911_v7, %v909_v5  ;;  %v1068_v18 = vadd.f32 %v1067_v11, %v2031_v15 }
 0x1ff   :  { %v1088_v25 = vmax.f32 %v1066_v17, 0.0 }
 0x200   :  { %1859 = vmatprep.subr.bf16.mxu1 %v1858_v16  ;;  %v1071_v19 = vpop.f32.mrb[36].mxu0  ;;  %v1089_v27 = vmax.f32 %v1068_v18, 0.0 }
 0x201   :  { %v1072_v20 = vadd.f32 %v1071_v19, %v2035_v22  ;;  %1861 = vmatpush1.bf16.xpose.msra.mxu1 %v1860_v10  ;;  %v1073_v21 = vpop.f32.mrb[37].mxu0 }
 0x202   :  { %v1074_v24 = vadd.f32 %v1073_v21, %v2035_v22 }
 0x203   :  { %v1090_v26 = vmax.f32 %v1072_v20, 0.0 }
 0x204   :  { %v1091_v28 = vmax.f32 %v1074_v24, 0.0  ;;  %v1077_v29 = vpop.f32.mrb[38].mxu0 }
 0x205   :  { %v1864_v30 = vpack.c.bf16 %v1090_v26, %v1088_v25  ;;  %v1079_v31 = vpop.f32.mrb[39].mxu0  ;;  %v1078_v9 = vadd.f32 %v1077_v29, %v2037_v23 }
 0x206   :  { %v1862_v32 = vpack.c.bf16 %v1091_v28, %v1089_v27  ;;  %v1080_v34 = vadd.f32 %v1079_v31, %v2037_v23 }
 0x207   :  { %v1092_v13 = vmax.f32 %v1078_v9, 0.0 }
 0x208   :  { %977 = vmatmul.mubr.f32.vlgmr.msra.gmra.mrb[14].mxu1 %v1915_v14  ;;  %v1083_v35 = vpop.f32.mrb[40].mxu0  ;;  %1863 = vmatprep.subr.bf16.mxu1 %v1862_v32  ;;  %v1093_v39 = vmax.f32 %v1080_v34, 0.0 }
 0x209   :  { %v1084_v12 = vadd.f32 %v1083_v35, %v2047_v52  ;;  %v1085_v36 = vpop.f32.mrb[41].mxu0  ;;  %1865 = vmatpush1.bf16.xpose.msra.mxu1 %v1864_v30  ;;  %1160 = vmatprep.mubr.f32.mxu1 %v1915_v14 }
 0x20a   :  { %v1086_v37 = vadd.f32 %v1085_v36, %v2047_v52 }
 0x20b   :  { %v1094_v38 = vmax.f32 %v1084_v12, 0.0 }
 0x20c   :  { %v1095_v40 = vmax.f32 %v1086_v37, 0.0  ;;  %v1249_v41 = vpop.f32.mrb[42].mxu0 }
 0x20d   :  { %v1868_v43 = vpack.c.bf16 %v1094_v38, %v1092_v13  ;;  %v1251_v44 = vpop.f32.mrb[43].mxu0  ;;  %v1250_v46 = vadd.f32 %v1249_v41, %v2031_v15 }
 0x20e   :  { %v1866_v45 = vpack.c.bf16 %v1095_v40, %v1093_v39  ;;  %v1252_v47 = vadd.f32 %v1251_v44, %v2031_v15 }
 0x20f   :  { %v1272_v53 = vmax.f32 %v1250_v46, 0.0 }
 0x210   :  { %1867 = vmatprep.subr.bf16.mxu1 %v1866_v45  ;;  %v1255_v48 = vpop.f32.mrb[44].mxu0  ;;  %v1273_v55 = vmax.f32 %v1252_v47, 0.0  ;;  %v1547_v45 = vld [vmem:[%s2292_s3 + $0x10] sm:$0xff]  ;;  %v1630_v47 = vld [vmem:[%s2293_s5] sm:$0xff] }
 0x211   :  { %v1256_v49 = vadd.f32 %v1255_v48, %v2035_v22  ;;  %1869 = vmatpush1.bf16.xpose.msra.mxu1 %v1868_v43  ;;  %v1257_v50 = vpop.f32.mrb[45].mxu0  ;;  %v1545_v43 = vld [vmem:[%s2292_s3] sm:$0xff]  ;;  %v1631_v48 = vld [vmem:[%s2293_s5 + $0x8] sm:$0xff] }
 0x212   :  { %v1258_v51 = vadd.f32 %v1257_v50, %v2035_v22 }
 0x213   :  { %v1274_v54 = vmax.f32 %v1256_v49, 0.0  ;;  %v1893_v49 = vpack.c.bf16 %v1631_v48, %v1630_v47 }
 0x214   :  { %v1275_v56 = vmax.f32 %v1258_v51, 0.0  ;;  %v1261_v57 = vpop.f32.mrb[46].mxu0  ;;  %v1745_v51 = vsel %vm614_vm5, 1.0, %v1913_v2 }
 0x215   :  { %v1872_v58 = vpack.c.bf16 %v1274_v54, %v1272_v53  ;;  %v1263_v59 = vpop.f32.mrb[47].mxu0  ;;  %v1262_v61 = vadd.f32 %v1261_v57, %v2037_v23 }
 0x216   :  { %v1870_v60 = vpack.c.bf16 %v1275_v56, %v1273_v55  ;;  %v1264_v62 = vadd.f32 %v1263_v59, %v2037_v23 }
 0x217   :  { %v1276_v4 = vmax.f32 %v1262_v61, 0.0 }
 0x218   :  { %1161 = vmatmul.mubr.f32.vlgmr.msra.gmra.mrb[16].mxu1 %v1915_v14  ;;  %v1267_v63 = vpop.f32.mrb[48].mxu0  ;;  %1871 = vmatprep.subr.bf16.mxu1 %v1870_v60  ;;  %v1277_v7 = vmax.f32 %v1264_v62, 0.0 }
 0x219   :  { %v1268_v0 = vadd.f32 %v1267_v63, %v2047_v52  ;;  %v1269_v1 = vpop.f32.mrb[49].mxu0  ;;  %1873 = vmatpush1.bf16.xpose.msra.mxu1 %v1872_v58  ;;  %1344 = vmatprep.mubr.f32.mxu1 %v1915_v14  ;;  %v1753_v58 = vsel %vm798_vm6, 1.0, %v1913_v2 }
 0x21a   :  { %v1270_v3 = vadd.f32 %v1269_v1, %v2047_v52 }
 0x21b   :  { %v1278_v5 = vmax.f32 %v1268_v0, 0.0  ;;  %v1761_v0 = vsel %vm982_vm7, 1.0, %v1913_v2 }
 0x21c   :  { %v1279_v8 = vmax.f32 %v1270_v3, 0.0  ;;  %v1433_v10 = vpop.f32.mrb[50].mxu0 }
 0x21d   :  { %v1876_v11 = vpack.c.bf16 %v1278_v5, %v1276_v4  ;;  %v1435_v16 = vpop.f32.mrb[51].mxu0  ;;  %v1434_v18 = vadd.f32 %v1433_v10, %v2031_v15 }
 0x21e   :  { %v1874_v17 = vpack.c.bf16 %v1279_v8, %v1277_v7  ;;  %v1436_v19 = vadd.f32 %v1435_v16, %v2031_v15  ;;  %v1769_v7 = vsel %vm1166_vm8, 1.0, %v1913_v2 }
 0x21f   :  { %v1456_v26 = vmax.f32 %v1434_v18, 0.0  ;;  %v1777_v18 = vsel %vm1350_vm9, 1.0, %v1913_v2 }
 0x220   :  { %1875 = vmatprep.subr.bf16.mxu1 %v1874_v17  ;;  %v1439_v20 = vpop.f32.mrb[52].mxu0  ;;  %v1457_v28 = vmax.f32 %v1436_v19, 0.0 }
 0x221   :  { %v1440_v21 = vadd.f32 %v1439_v20, %v2035_v22  ;;  %1877 = vmatpush1.bf16.xpose.msra.mxu1 %v1876_v11  ;;  %v1441_v24 = vpop.f32.mrb[53].mxu0 }
 0x222   :  { %v1442_v25 = vadd.f32 %v1441_v24, %v2035_v22 }
 0x223   :  { %v1458_v27 = vmax.f32 %v1440_v21, 0.0 }
 0x224   :  { %v1459_v29 = vmax.f32 %v1442_v25, 0.0  ;;  %v1445_v30 = vpop.f32.mrb[54].mxu0 }
 0x225   :  { %v1880_v31 = vpack.c.bf16 %v1458_v27, %v1456_v26  ;;  %v1447_v32 = vpop.f32.mrb[55].mxu0  ;;  %v1446_v34 = vadd.f32 %v1445_v30, %v2037_v23  ;;  %v1785_v26 = vsel %vm1534_vm10, 1.0, %v1913_v2 }
 0x226   :  { %v1878_v9 = vpack.c.bf16 %v1459_v29, %v1457_v28  ;;  %v1448_v15 = vadd.f32 %v1447_v32, %v2037_v23  ;;  %v1916_v23 = vmov 0.0|0.0  }
 0x227   :  { %v1460_v37 = vmax.f32 %v1446_v34, 0.0  ;;  %1886 = vmatprep.subr.bf16.mxu0 %v1916_v23 }
 0x228   :  { %1345 = vmatmul.mubr.f32.vlgmr.msra.gmra.mrb[18].mxu1 %v1915_v14  ;;  %v1451_v35 = vpop.f32.mrb[56].mxu0  ;;  %1879 = vmatprep.subr.bf16.mxu1 %v1878_v9  ;;  %v1461_v38 = vmax.f32 %v1448_v15, 0.0 }
 0x229   :  { %v1452_v12 = vadd.f32 %v1451_v35, %v2047_v52  ;;  %v1453_v36 = vpop.f32.mrb[57].mxu0  ;;  %1881 = vmatpush1.bf16.xpose.msra.mxu1 %v1880_v31  ;;  %1528 = vmatprep.mubr.f32.mxu1 %v1915_v14  ;;  %v1632_v31 = vld [vmem:[%s2293_s5 + $0x10] sm:$0xff]  ;;  %v1788_v35 = vld [vmem:[%s2296_s6] ss:$0 sm:$0xff] }
 0x22a   :  { %v1454_v22 = vadd.f32 %v1453_v36, %v2047_v52  ;;  %v1546_v52 = vld [vmem:[%s2292_s3 + $0x8] sm:$0xff] }
 0x22b   :  { %v1462_v13 = vmax.f32 %v1452_v12, 0.0  ;;  %v1887_v44 = vpack.c.bf16 %v1546_v52, %v1545_v43 }
 0x22c   :  { %v1463_v39 = vmax.f32 %v1454_v22, 0.0 }
 0x22d   :  { %v1884_v40 = vpack.c.bf16 %v1462_v13, %v1460_v37  ;;  %1888 = vmatpush3.bf16.msra.mxu0 %v1887_v44 }
 0x22e   :  { %v1882_v41 = vpack.c.bf16 %v1463_v39, %v1461_v38  ;;  %1889 = vmatprep.subr.bf16.mxu0 %v1916_v23 }
 0x230   :  { %1883 = vmatprep.subr.bf16.mxu1 %v1882_v41 }
 0x231   :  { %1885 = vmatpush1.bf16.xpose.msra.mxu1 %v1884_v40 }
 0x232   :  { %1892 = vmatprep.subr.bf16.mxu1 %v1916_v23 }
 0x238   :  { %1529 = vmatmul.mubr.f32.vlgmr.msra.gmra.mrb[20].mxu1 %v1915_v14  ;;  %v1548_v14 = vld [vmem:[%s2292_s3 + $0x18] sm:$0xff] }
 0x239   :  { %v1890_v46 = vpack.c.bf16 %v1548_v14, %v1547_v45  ;;  %1819 = vmatprep.mubr.msk.f32.mxu1 %vm1917_vm4, %v1913_v2  ;;  %1894 = vmatpush3.bf16.msra.mxu1 %v1893_v49  ;;  %v1896_v2 = vpack.c.bf16 %v1633_v33, %v1632_v31 }
 0x23a   :  { %1895 = vmatprep.subr.bf16.mxu1 %v1916_v23 }
 0x23b   :  { %1891 = vmatpush3.bf16.msra.mxu0 %v1890_v46 }
 0x23d   :  { %1897 = vmatpush3.bf16.msra.mxu1 %v1896_v2 }
 0x2bb   :  { %v610_v50 = vpop.f32.mrb[10].mxu1 }
 0x2bc   :  { %v620_v53 = vrot.slane %v610_v50, %v2164_v6  ;;  %v612_v54 = vpop.f32.mrb[11].mxu1 }
 0x2be   :  { %v621_v55 = vmul.f32 %v1745_v51, %v620_v53 }
 0x2c0   :  { %v622_v56 = vadd.f32 %v621_v55, %v2171_v42 }
 0x2cb   :  { %v794_v57 = vpop.f32.mrb[12].mxu1 }
 0x2cc   :  { %v804_v59 = vrot.slane %v794_v57, %v2164_v6  ;;  %v796_v60 = vpop.f32.mrb[13].mxu1 }
 0x2ce   :  { %v805_v61 = vmul.f32 %v1753_v58, %v804_v59 }
 0x2d0   :  { %v806_v62 = vadd.f32 %v805_v61, %v622_v56 }
 0x2db   :  { %v978_v63 = vpop.f32.mrb[14].mxu1 }
 0x2dc   :  { %v988_v1 = vrot.slane %v978_v63, %v2164_v6  ;;  %v980_v3 = vpop.f32.mrb[15].mxu1 }
 0x2de   :  { %v989_v4 = vmul.f32 %v1761_v0, %v988_v1 }
 0x2e0   :  { %v990_v42 = vadd.f32 %v989_v4, %v806_v62 }
 0x2eb   :  { %v1162_v5 = vpop.f32.mrb[16].mxu1 }
 0x2ec   :  { %v1172_v8 = vrot.slane %v1162_v5, %v2164_v6  ;;  %v1164_v10 = vpop.f32.mrb[17].mxu1 }
 0x2ee   :  { %v1173_v11 = vmul.f32 %v1769_v7, %v1172_v8 }
 0x2f0   :  { %v1174_v16 = vadd.f32 %v1173_v11, %v990_v42 }
 0x2fb   :  { %v1346_v17 = vpop.f32.mrb[18].mxu1 }
 0x2fc   :  { %v1356_v19 = vrot.slane %v1346_v17, %v2164_v6  ;;  %v1348_v20 = vpop.f32.mrb[19].mxu1 }
 0x2fe   :  { %v1357_v21 = vmul.f32 %v1777_v18, %v1356_v19 }
 0x300   :  { %v1358_v24 = vadd.f32 %v1357_v21, %v1174_v16 }
 0x30b   :  { %v1530_v25 = vpop.f32.mrb[20].mxu1 }
 0x30c   :  { %v1540_v27 = vrot.slane %v1530_v25, %v2164_v6  ;;  %v1532_v28 = vpop.f32.mrb[21].mxu1  ;;  %v1786_v6 = vld [vmem:[%s2295_s4] ss:$0 sm:$0xff] }
 0x30e   :  { %v1541_v29 = vmul.f32 %v1785_v26, %v1540_v27 }
 0x310   :  { %v1542_v30 = vadd.f32 %v1541_v29, %v1358_v24 }
 0x312   :  { %1544 = vst.msk [vmem:[%s2294_s8] sm:$0xff] %vm1543_vm11, %v1542_v30  ;;  %1809 = vmatmul.mubr.msk.f32.vlgmr.msra.gmra.mrb[58].mxu0 %vm1543_vm11, %v1542_v30 }
 0x3e5   :  { %v1625_v32 = vpop.f32.mrb[58].mxu0 }
 0x3e6   :  { %v1626_v9 = vadd.f32 %v1786_v6, %v1625_v32  ;;  %v1810_v34 = vpop.f32.mrb[59].mxu0 }
 0x3e8   :  { %v1629_v15 = vmax.f32 %v1626_v9, 0.0 }
 0x3ea   :  { %1820 = vmatmul.mubr.msk.f32.vlgmr.msra.gmra.mrb[22].mxu1 %vm1543_vm11, %v1629_v15 }
 0x4bd   :  { %v1710_v12 = vpop.f32.mrb[22].mxu1 }
 0x4be   :  { %v1711_v36 = vadd.f32 %v1788_v35, %v1710_v12  ;;  %v1821_v22 = vpop.f32.mrb[23].mxu1 }
 0x4c0   :  { %1714 = vst [vmem:[%s2297_s7] sm:$0xff] %v1711_v36 }

</bundles_post_ra>
